<compile_context>
chip_gen: v7x
topology: tpu7x:2x2x1
jax: 0.10.0
libtpu: 0.0.40
codegen_flags: <defaults>
</compile_context>

<pallas_src>
import functools

import jax
import jax.numpy as jnp
from jax import lax
from jax.experimental import pallas as pl
from jax.experimental.pallas import tpu as pltpu

_LANE = 128
_MAX_BLOCK_ROWS = 8192   # 8192 x 128 x 4 B = 4 MiB f32 per input per buffer


def _make_kernel(block_rows, total_rows, n_full_blocks, needs_mask):
    """Streaming partial-sum kernel over a (rows, 128) lane-dense slab."""

    def kernel(x_ref, t_ref, tp_ref, p_ref, ts_ref):
        c = pl.program_id(0)          # core-split index ("parallel")
        i = pl.program_id(1)          # streaming block index ("arbitrary")

        # Per-core accumulators live directly in the (1, 1, 128) output blocks,
        # which stay VMEM-resident across the inner (arbitrary) axis.
        @pl.when(i == 0)
        def _():
            tp_ref[...] = jnp.zeros_like(tp_ref)
            p_ref[...] = jnp.zeros_like(p_ref)
            ts_ref[...] = jnp.zeros_like(ts_ref)

        x = x_ref[...]                              # (block_rows, 128) inputs
        tgt = t_ref[...].astype(jnp.float32)        # (block_rows, 128) targets
        pred = (x > 0.5).astype(jnp.float32)        # matches (inputs > 0.5).float()

        def accumulate(p, t):
            # Sublane reduce per block; (1,128) broadcasts into the (1,1,128) refs.
            tp_ref[...] += jnp.sum(p * t, axis=0, keepdims=True)   # sum(pred*tgt)
            p_ref[...] += jnp.sum(p, axis=0, keepdims=True)        # sum(pred)
            ts_ref[...] += jnp.sum(t, axis=0, keepdims=True)       # sum(tgt)

        if needs_mask:
            # Only emitted for ragged launches; at runtime only the blocks past
            # the last fully-valid one pay for the mask (fast path otherwise).
            logical = c * pl.num_programs(1) + i    # logical block index

            @pl.when(logical < n_full_blocks)
            def _():
                accumulate(pred, tgt)

            @pl.when(logical >= n_full_blocks)
            def _():
                row = lax.broadcasted_iota(jnp.int32, (block_rows, 1), 0)
                valid = (logical * block_rows + row) < total_rows
                accumulate(jnp.where(valid, pred, 0.0),
                           jnp.where(valid, tgt, 0.0))
        else:
            accumulate(pred, tgt)

    return kernel


_F32 = jnp.dtype(jnp.float32)
_BF16 = jnp.dtype(jnp.bfloat16)
_F16 = jnp.dtype(jnp.float16)


def _prep_inputs(a):
    dt = jnp.dtype(a.dtype)
    if dt == _F16:
        a = a.astype(jnp.bfloat16)          # no f32 blow-up for half inputs
    elif dt not in (_F32, _BF16):
        a = a.astype(jnp.float32)
    return a.reshape(-1)


def _prep_targets(a):
    dt = jnp.dtype(a.dtype)
    if dt in (jnp.dtype(jnp.bool_), jnp.dtype(jnp.uint8), jnp.dtype(jnp.int8)):
        a = a.astype(jnp.int8)              # binary masks stream at 1 B/elem
    elif dt == _F16:
        a = a.astype(jnp.bfloat16)
    elif dt not in (_F32, _BF16):
        a = a.astype(jnp.float32)
    return a.reshape(-1)


@functools.partial(
    jax.jit, static_argnames=("alpha", "beta", "gamma", "smooth", "block_rows"))
def focal_tversky_loss(inputs, targets, alpha=0.8, beta=0.2, gamma=2, smooth=1.0,
                       block_rows=None):
    """Pallas-TPU implementation of FocalTverskyLoss.forward."""
    x_flat = _prep_inputs(inputs)
    t_flat = _prep_targets(targets)
    assert x_flat.shape == t_flat.shape, (x_flat.shape, t_flat.shape)
    numel = x_flat.shape[0]

    rows = numel // _LANE
    main = rows * _LANE

    # <=127-element lane tail handled in plain JAX (no wrapper-side pad copy).
    if main < numel:
        tail_pred = (x_flat[main:] > 0.5).astype(jnp.float32)
        tail_tgt = t_flat[main:].astype(jnp.float32)
        tp_tail = jnp.sum(tail_pred * tail_tgt)
        p_tail = jnp.sum(tail_pred)
        t_tail = jnp.sum(tail_tgt)
    else:
        tp_tail = p_tail = t_tail = jnp.float32(0.0)

    if rows > 0:
        # TODO(synk): for ragged numel this prefix slice is still one HBM copy;
        # a fully zero-copy ragged path would need manual 1-D DMA of the flat
        # array.  For numel % 128 == 0 (the common case) the reshape is a free
        # bitcast and no copy is made.
        x2 = x_flat[:main].reshape(rows, _LANE)
        t2 = t_flat[:main].reshape(rows, _LANE)

        br = _MAX_BLOCK_ROWS if block_rows is None else int(block_rows)
        br = max(32, (br // 32) * 32)       # keep int8/bf16/f32 sublane tiles legal
        if br >= rows:
            br = rows                       # full-extent block (always legal)

        n_blocks = pl.cdiv(rows, br)
        # 2-way core split (v7x has 2 TensorCores).  Only enable it when the
        # wasted, fully-masked duplicate block is absent or <= 1/8 of the work,
        # so single-core chips (v5e/v6e) see no extra HBM traffic.
        split = 2 if (n_blocks >= 2 and (n_blocks % 2 == 0 or n_blocks >= 8)) else 1
        bpc = pl.cdiv(n_blocks, split)      # streaming steps per core
        n_full_blocks = rows // br
        needs_mask = (split * bpc * br) != rows

        kernel = _make_kernel(br, rows, n_full_blocks, needs_mask)

        def in_idx(c, i):
            # Clamp so the duplicate block of an odd split stays in range; its
            # contribution is masked to zero inside the kernel.
            return (jnp.minimum(c * bpc + i, n_blocks - 1), 0)

        out_block = pl.BlockSpec((1, 1, _LANE), lambda c, i: (c, 0, 0))
        part_shape = jax.ShapeDtypeStruct((split, 1, _LANE), jnp.float32)

        block_bytes = br * _LANE * (x2.dtype.itemsize + t2.dtype.itemsize)
        # Double-buffered input blocks + generous slack for in-kernel f32
        # temporaries; well inside physical VMEM on v5e/v6e/v7x.
        vmem_limit = int(2 * block_bytes + (20 << 20))

        cost = pl.CostEstimate(
            flops=6 * main,
            transcendentals=0,
            bytes_accessed=main * (x2.dtype.itemsize + t2.dtype.itemsize))

        tp_p, p_p, t_p = pl.pallas_call(
            kernel,
            out_shape=(part_shape, part_shape, part_shape),
            grid_spec=pltpu.PrefetchScalarGridSpec(
                num_scalar_prefetch=0,
                grid=(split, bpc),
                in_specs=[pl.BlockSpec((br, _LANE), in_idx),
                          pl.BlockSpec((br, _LANE), in_idx)],
                out_specs=(out_block, out_block, out_block),
            ),
            compiler_params=pltpu.CompilerParams(
                dimension_semantics=("parallel", "arbitrary"),
                vmem_limit_bytes=vmem_limit),
            cost_estimate=cost,
        )(x2, t2)

        tp = jnp.sum(tp_p) + tp_tail
        sum_pred = jnp.sum(p_p) + p_tail
        sum_tgt = jnp.sum(t_p) + t_tail
    else:
        tp, sum_pred, sum_tgt = tp_tail, p_tail, t_tail

    fp = sum_pred - tp                        # sum((1 - targets) * pred)
    fn = sum_tgt - tp                         # sum(targets * (1 - pred))
    tversky = (tp + smooth) / (tp + alpha * fp + beta * fn + smooth)
    return (1.0 - tversky) ** gamma


def _reference(inputs, targets, alpha=0.8, beta=0.2, gamma=2, smooth=1.0):
    """Plain-JAX reference mirroring the PyTorch forward, for validation."""
    pred = (inputs.reshape(-1) > 0.5).astype(jnp.float32)
    tgt = targets.reshape(-1).astype(jnp.float32)
    tp = jnp.sum(pred * tgt)
    fp = jnp.sum((1.0 - tgt) * pred)
    fn = jnp.sum(tgt * (1.0 - pred))
    tversky = (tp + smooth) / (tp + alpha * fp + beta * fn + smooth)
    return (1.0 - tversky) ** gamma


if __name__ == "__main__":
    key = jax.random.PRNGKey(0)
    k1, k2, k3, k4 = jax.random.split(key, 4)

    # Primary check: NCHW, small shapes (batch=2, channels=4, spatial=16x16).
    inputs = jax.random.uniform(k1, (2, 4, 16, 16), dtype=jnp.float32)
    targets = (jax.random.uniform(k2, (2, 4, 16, 16)) > 0.5).astype(jnp.float32)
    loss = jax.block_until_ready(focal_tversky_loss(inputs, targets))
    ref = _reference(inputs, targets)
    assert jnp.allclose(loss, ref, rtol=1e-4, atol=1e-6), (loss, ref)

    # Ragged numel (not a multiple of 128) + bool targets -> exercises the
    # JAX-side lane tail and the native int8 target streaming path.
    inputs2 = jax.random.uniform(k3, (2, 4, 182, 182), dtype=jnp.float32)
    targets2 = jax.random.uniform(k4, (2, 4, 182, 182)) > 0.5   # bool mask
    loss2 = jax.block_until_ready(focal_tversky_loss(inputs2, targets2))
    ref2 = _reference(inputs2, targets2)
    assert jnp.allclose(loss2, ref2, rtol=1e-4, atol=1e-6), (loss2, ref2)

    # Small block override -> exercises the multi-block streaming loop, the
    # 2-way core split, the clamped index map and the gated row masking.
    loss3 = jax.block_until_ready(
        focal_tversky_loss(inputs2, targets2, block_rows=256))
    assert jnp.allclose(loss3, ref2, rtol=1e-4, atol=1e-6), (loss3, ref2)

    print("KERNEL_OK")
</pallas_src>

<mosaic_0001>
module attributes {stable_mosaic.version = 11 : i64} {
  func.func @kernel(%arg0: i32, %arg1: i32, %arg2: memref<16x128xf32, #tpu.memory_space<vmem>>, %arg3: memref<16x128xf32, #tpu.memory_space<vmem>>, %arg4: memref<1x1x128xf32, #tpu.memory_space<vmem>>, %arg5: memref<1x1x128xf32, #tpu.memory_space<vmem>>, %arg6: memref<1x1x128xf32, #tpu.memory_space<vmem>>) attributes {dimension_semantics = [#tpu.dimension_semantics<parallel>, #tpu.dimension_semantics<arbitrary>], iteration_bounds = array<i64: 1, 1>, scalar_prefetch = 0 : i64, scratch_operands = 0 : i64, tpu.core_type = #tpu.core_type<tc>, window_params = [{transform_indices = @transform_0, window_bounds = array<i64: 16, 128>}, {transform_indices = @transform_1, window_bounds = array<i64: 16, 128>}, {transform_indices = @transform_2, window_bounds = array<i64: 1, 1, 128>}, {transform_indices = @transform_3, window_bounds = array<i64: 1, 1, 128>}, {transform_indices = @transform_4, window_bounds = array<i64: 1, 1, 128>}]} {
    %c0_i32 = arith.constant 0 : i32
    %0 = arith.cmpi eq, %arg1, %c0_i32 : i32
    %1 = arith.extui %0 : i1 to i32
    %c0_i32_0 = arith.constant 0 : i32
    %2 = arith.cmpi ne, %1, %c0_i32_0 : i32
    scf.if %2 {
      %cst_25 = arith.constant 0.000000e+00 : f32
      %28 = vector.broadcast %cst_25 : f32 to vector<1x1x128xf32>
      %c0_26 = arith.constant 0 : index
      %c0_27 = arith.constant 0 : index
      %c0_28 = arith.constant 0 : index
      %29 = vector.load %arg4[%c0_26, %c0_27, %c0_28] : memref<1x1x128xf32, #tpu.memory_space<vmem>>, vector<1x1x128xf32>
      tpu.vector_store %arg4[%c0_26, %c0_27, %c0_28], %28 {strides = array<i32>} : memref<1x1x128xf32, #tpu.memory_space<vmem>>, vector<1x1x128xf32>,
      %cst_29 = arith.constant 0.000000e+00 : f32
      %30 = vector.broadcast %cst_29 : f32 to vector<1x1x128xf32>
      %c0_30 = arith.constant 0 : index
      %c0_31 = arith.constant 0 : index
      %c0_32 = arith.constant 0 : index
      %31 = vector.load %arg5[%c0_30, %c0_31, %c0_32] : memref<1x1x128xf32, #tpu.memory_space<vmem>>, vector<1x1x128xf32>
      tpu.vector_store %arg5[%c0_30, %c0_31, %c0_32], %30 {strides = array<i32>} : memref<1x1x128xf32, #tpu.memory_space<vmem>>, vector<1x1x128xf32>,
      %cst_33 = arith.constant 0.000000e+00 : f32
      %32 = vector.broadcast %cst_33 : f32 to vector<1x1x128xf32>
      %c0_34 = arith.constant 0 : index
      %c0_35 = arith.constant 0 : index
      %c0_36 = arith.constant 0 : index
      %33 = vector.load %arg6[%c0_34, %c0_35, %c0_36] : memref<1x1x128xf32, #tpu.memory_space<vmem>>, vector<1x1x128xf32>
      tpu.vector_store %arg6[%c0_34, %c0_35, %c0_36], %32 {strides = array<i32>} : memref<1x1x128xf32, #tpu.memory_space<vmem>>, vector<1x1x128xf32>,
    } else {
    }
    %c0 = arith.constant 0 : index
    %c0_1 = arith.constant 0 : index
    %3 = vector.load %arg2[%c0, %c0_1] : memref<16x128xf32, #tpu.memory_space<vmem>>, vector<16x128xf32>
    %c0_2 = arith.constant 0 : index
    %c0_3 = arith.constant 0 : index
    %4 = vector.load %arg3[%c0_2, %c0_3] : memref<16x128xf32, #tpu.memory_space<vmem>>, vector<16x128xf32>
    %cst = arith.constant 5.000000e-01 : f32
    %5 = vector.broadcast %cst : f32 to vector<16x128xf32>
    %6 = arith.cmpf ogt, %3, %5 : vector<16x128xf32>
    %7 = arith.extui %6 : vector<16x128xi1> to vector<16x128xi32>
    %8 = arith.sitofp %7 : vector<16x128xi32> to vector<16x128xf32>
    %c0_4 = arith.constant 0 : index
    %c0_5 = arith.constant 0 : index
    %c0_6 = arith.constant 0 : index
    %9 = vector.load %arg4[%c0_4, %c0_5, %c0_6] : memref<1x1x128xf32, #tpu.memory_space<vmem>>, vector<1x1x128xf32>
    %10 = arith.mulf %8, %4 : vector<16x128xf32>
    %cst_7 = arith.constant dense<0.000000e+00> : vector<128xf32>
    %11 = vector.multi_reduction <add>, %10, %cst_7 [0] : vector<16x128xf32> to vector<128xf32>
    %12 = vector.shape_cast %11 : vector<128xf32> to vector<1x128xf32>
    %13 = vector.shape_cast %12 : vector<1x128xf32> to vector<1x1x128xf32>
    %14 = arith.addf %9, %13 : vector<1x1x128xf32>
    %c0_8 = arith.constant 0 : index
    %c0_9 = arith.constant 0 : index
    %c0_10 = arith.constant 0 : index
    %15 = vector.load %arg4[%c0_8, %c0_9, %c0_10] : memref<1x1x128xf32, #tpu.memory_space<vmem>>, vector<1x1x128xf32>
    tpu.vector_store %arg4[%c0_8, %c0_9, %c0_10], %14 {strides = array<i32>} : memref<1x1x128xf32, #tpu.memory_space<vmem>>, vector<1x1x128xf32>,
    %c0_11 = arith.constant 0 : index
    %c0_12 = arith.constant 0 : index
    %c0_13 = arith.constant 0 : index
    %16 = vector.load %arg5[%c0_11, %c0_12, %c0_13] : memref<1x1x128xf32, #tpu.memory_space<vmem>>, vector<1x1x128xf32>
    %cst_14 = arith.constant dense<0.000000e+00> : vector<128xf32>
    %17 = vector.multi_reduction <add>, %8, %cst_14 [0] : vector<16x128xf32> to vector<128xf32>
    %18 = vector.shape_cast %17 : vector<128xf32> to vector<1x128xf32>
    %19 = vector.shape_cast %18 : vector<1x128xf32> to vector<1x1x128xf32>
    %20 = arith.addf %16, %19 : vector<1x1x128xf32>
    %c0_15 = arith.constant 0 : index
    %c0_16 = arith.constant 0 : index
    %c0_17 = arith.constant 0 : index
    %21 = vector.load %arg5[%c0_15, %c0_16, %c0_17] : memref<1x1x128xf32, #tpu.memory_space<vmem>>, vector<1x1x128xf32>
    tpu.vector_store %arg5[%c0_15, %c0_16, %c0_17], %20 {strides = array<i32>} : memref<1x1x128xf32, #tpu.memory_space<vmem>>, vector<1x1x128xf32>,
    %c0_18 = arith.constant 0 : index
    %c0_19 = arith.constant 0 : index
    %c0_20 = arith.constant 0 : index
    %22 = vector.load %arg6[%c0_18, %c0_19, %c0_20] : memref<1x1x128xf32, #tpu.memory_space<vmem>>, vector<1x1x128xf32>
    %cst_21 = arith.constant dense<0.000000e+00> : vector<128xf32>
    %23 = vector.multi_reduction <add>, %4, %cst_21 [0] : vector<16x128xf32> to vector<128xf32>
    %24 = vector.shape_cast %23 : vector<128xf32> to vector<1x128xf32>
    %25 = vector.shape_cast %24 : vector<1x128xf32> to vector<1x1x128xf32>
    %26 = arith.addf %22, %25 : vector<1x1x128xf32>
    %c0_22 = arith.constant 0 : index
    %c0_23 = arith.constant 0 : index
    %c0_24 = arith.constant 0 : index
    %27 = vector.load %arg6[%c0_22, %c0_23, %c0_24] : memref<1x1x128xf32, #tpu.memory_space<vmem>>, vector<1x1x128xf32>
    tpu.vector_store %arg6[%c0_22, %c0_23, %c0_24], %26 {strides = array<i32>} : memref<1x1x128xf32, #tpu.memory_space<vmem>>, vector<1x1x128xf32>,
    return
  }
  func.func @transform_0(%arg0: i32, %arg1: i32) -> (i32, i32) {
    %c1_i32 = arith.constant 1 : i32
    %0 = arith.muli %arg0, %c1_i32 : i32
    %1 = arith.addi %0, %arg1 : i32
    %c0_i32 = arith.constant 0 : i32
    %2 = arith.minsi %1, %c0_i32 : i32
    %c0_i32_0 = arith.constant 0 : i32
    %c0_i32_1 = arith.constant 0 : i32
    return %2, %c0_i32_0 : i32, i32
  }
  func.func @transform_1(%arg0: i32, %arg1: i32) -> (i32, i32) {
    %c1_i32 = arith.constant 1 : i32
    %0 = arith.muli %arg0, %c1_i32 : i32
    %1 = arith.addi %0, %arg1 : i32
    %c0_i32 = arith.constant 0 : i32
    %2 = arith.minsi %1, %c0_i32 : i32
    %c0_i32_0 = arith.constant 0 : i32
    %c0_i32_1 = arith.constant 0 : i32
    return %2, %c0_i32_0 : i32, i32
  }
  func.func @transform_2(%arg0: i32, %arg1: i32) -> (i32, i32, i32) {
    %c0_i32 = arith.constant 0 : i32
    %c0_i32_0 = arith.constant 0 : i32
    %c0_i32_1 = arith.constant 0 : i32
    return %arg0, %c0_i32, %c0_i32_0 : i32, i32, i32
  }
  func.func @transform_3(%arg0: i32, %arg1: i32) -> (i32, i32, i32) {
    %c0_i32 = arith.constant 0 : i32
    %c0_i32_0 = arith.constant 0 : i32
    %c0_i32_1 = arith.constant 0 : i32
    return %arg0, %c0_i32, %c0_i32_0 : i32, i32, i32
  }
  func.func @transform_4(%arg0: i32, %arg1: i32) -> (i32, i32, i32) {
    %c0_i32 = arith.constant 0 : i32
    %c0_i32_0 = arith.constant 0 : i32
    %c0_i32_1 = arith.constant 0 : i32
    return %arg0, %c0_i32, %c0_i32_0 : i32, i32, i32
  }
}

</mosaic_0001>

<bundles_post_ra>
// kernel: focal_tversky_loss.1
= control target key start
LH: loop header
LB: loop body
LE: loop exit
PB: predicated region body
PF: predicated region fallthrough
CT: control target
= control target key end

     0   :  { %v154_v0 = vmov 0.0   ;;  %s219_s0 = inlined_call_operand.vmem [shape: f32[16,128], index: 0, kind: input, shape index: {}]   ;;  %s220_s1 = inlined_call_operand.vmem [shape: f32[16,128], index: 1, kind: input, shape index: {}]   ;;  %s221_s2 = inlined_call_operand.vmem [shape: f32[1,1,128], index: 2, kind: output, shape index: {0}]   ;;  %s222_s3 = inlined_call_operand.vmem [shape: f32[1,1,128], index: 3, kind: output, shape index: {1}]   ;;  %s223_s4 = inlined_call_operand.vmem [shape: f32[1,1,128], index: 4, kind: output, shape index: {2}]  }
   0x1   :  { %82 = vst [vmem:[%s221_s2] sm:$0x1] %v154_v0  ;;  %v85_v1 = vld [vmem:[%s219_s0] sm:$0xff]  ;;  %v86_v2 = vld [vmem:[%s219_s0 + $0x8] sm:$0xff]  ;;  %83 = vst [vmem:[%s222_s3] sm:$0x1] %v154_v0 }
   0x2   :  { %v87_v3 = vld [vmem:[%s220_s1] sm:$0xff]  ;;  %84 = vst [vmem:[%s223_s4] sm:$0x1] %v154_v0  ;;  %v88_v4 = vld [vmem:[%s220_s1 + $0x8] sm:$0xff]  ;;  %vm89_vm0 = vcmp.gt.f32.partialorder %v85_v1, 0.5  ;;  %vm90_vm1 = vcmp.gt.f32.partialorder %v86_v2, 0.5 }
   0x3   :  { %v151_v5 = vsel %vm89_vm0, 1.0, %v154_v0  ;;  %v152_v6 = vsel %vm90_vm1, 1.0, %v154_v0  ;;  %v118_v7 = vadd.f32 %v88_v4, %v87_v3 }
   0x4   :  { %v96_v8 = vmul.f32 %v151_v5, %v87_v3  ;;  %v97_v9 = vmul.f32 %v152_v6, %v88_v4  ;;  %v108_v10 = vadd.f32 %v152_v6, %v151_v5 }
   0x5   :  { %v119_v11 = vrot.slane %v118_v7, 4 }
   0x6   :  { %v98_v12 = vadd.f32 %v97_v9, %v96_v8  ;;  %v109_v13 = vrot.slane %v108_v10, 4 }
   0x7   :  { %v120_v14 = vadd.f32 %v119_v11, %v118_v7 }
   0x8   :  { %v99_v15 = vrot.slane %v98_v12, 4  ;;  %v110_v16 = vadd.f32 %v109_v13, %v108_v10  ;;  %v107_v27 = vld [vmem:[%s222_s3] sm:$0x1] }
   0x9   :  { %v121_v17 = vrot.slane %v120_v14, 2  ;;  %v117_v26 = vld [vmem:[%s223_s4] sm:$0x1] }
   0xa   :  { %v100_v18 = vadd.f32 %v99_v15, %v98_v12  ;;  %v111_v19 = vrot.slane %v110_v16, 2  ;;  %v95_v31 = vld [vmem:[%s221_s2] sm:$0x1] }
   0xb   :  { %v122_v20 = vadd.f32 %v121_v17, %v120_v14 }
   0xc   :  { %v101_v21 = vrot.slane %v100_v18, 2  ;;  %v112_v22 = vadd.f32 %v111_v19, %v110_v16 }
   0xd   :  { %v123_v23 = vrot.slane %v122_v20, 1 }
   0xe   :  { %v102_v24 = vadd.f32 %v101_v21, %v100_v18  ;;  %v113_v25 = vrot.slane %v112_v22, 1 }
   0xf   :  { %v124_v28 = vadd.f32 %v123_v23, %v122_v20 }
  0x10   :  { %v103_v29 = vrot.slane %v102_v24, 1  ;;  %v114_v30 = vadd.f32 %v113_v25, %v112_v22 }
  0x11   :  { %v125_v32 = vadd.f32 %v124_v28, %v117_v26 }
  0x12   :  { %v104_v33 = vadd.f32 %v103_v29, %v102_v24  ;;  %v115_v34 = vadd.f32 %v114_v30, %v107_v27 }
  0x13   :  { %126 = vst [vmem:[%s223_s4] sm:$0x1] %v125_v32 }
  0x14   :  { %v105_v35 = vadd.f32 %v104_v33, %v95_v31  ;;  %116 = vst [vmem:[%s222_s3] sm:$0x1] %v115_v34 }
  0x16   :  { %106 = vst [vmem:[%s221_s2] sm:$0x1] %v105_v35 }

</bundles_post_ra>
